<compile_context>
chip_gen: v5e
topology: v5e:2x2
jax: 0.10.0
libtpu: 0.0.40
codegen_flags: <defaults>
</compile_context>

<pallas_src>
import functools
import math

import jax
import jax.numpy as jnp
from jax.experimental import pallas as pl
from jax.experimental.pallas import tpu as pltpu

# ---- "opt" / "dyn" constants (synthetic, deterministic) --------------------
T_HORIZON = 1.0
INTERVAL = 100.0
SIGMA_MIN = 0.1
SIGMA_MAX = 2.0

_NORM_SCALE = math.sqrt(T_HORIZON / INTERVAL) / math.sqrt(2.0)
_NORM_C0 = SIGMA_MIN * _NORM_SCALE                   # constant term
_NORM_C1 = (SIGMA_MAX - SIGMA_MIN) * _NORM_SCALE     # coefficient of t


def _net_wrapper_kernel(x_ref, v_ref, t_ref,
                        wx_ref, wv_ref, wt_ref, b1_ref,
                        wo_ref, bo_ref,
                        out_ref):
    """Fused time-conditioned MLP + ssm output normalization.

    x_ref  : (tm, D) f32    flattened x tile  (pipelined)
    v_ref  : (tm, D) f32    flattened v tile  (pipelined)
    t_ref  : (tm, 1) f32    per-sample time   (pipelined)
    wx_ref : (D, H)  bf16   x projection      (grid-invariant / resident)
    wv_ref : (D, H)  bf16   v projection      (resident)
    wt_ref : (1, H)  f32    time projection   (resident)
    b1_ref : (1, H)  f32                       (resident)
    wo_ref : (H, D)  bf16   output projection (resident)
    bo_ref : (1, D)  f32                       (resident)
    out_ref: (tm, D) out_dtype
    """
    t = t_ref[...]                                            # (tm, 1) f32

    # hidden layer: two bf16 MXU matmuls (K = D each), f32 accumulation.
    # Cast to bf16 happens in VMEM (VPU) — inputs stream from HBM as f32 once.
    xb = x_ref[...].astype(jnp.bfloat16)
    vb = v_ref[...].astype(jnp.bfloat16)
    h = jnp.dot(xb, wx_ref[...], preferred_element_type=jnp.float32)
    h = h + jnp.dot(vb, wv_ref[...], preferred_element_type=jnp.float32)
    h = h + t * wt_ref[...] + b1_ref[...]                     # time conditioning
    h = jnp.maximum(h, 0.0)                                   # ReLU (VPU)

    # output layer (bf16 MXU, f32 accumulation)
    out = jnp.dot(h.astype(wo_ref.dtype), wo_ref[...],
                  preferred_element_type=jnp.float32)         # (tm, D)
    out = out + bo_ref[...]

    # ssm normalization folded to one FMA per row:
    #   norm = sigma(t) * sqrt(T/interval)/sqrt(2) = t * C1 + C0
    norm = t * _NORM_C1 + _NORM_C0                            # (tm, 1)
    out_ref[...] = (out * norm).astype(out_ref.dtype)


def _pick_tile(bs):
    """Batch tile: 16-row aligned; large batches use up to 512 rows while
    keeping >= 2 grid steps so the parallel axis can shard across both
    TensorCores on v7x (v5e/v6e simply get big tiles)."""
    r16 = ((bs + 15) // 16) * 16
    if r16 <= 32:
        return r16
    half = ((((bs + 1) // 2) + 15) // 16) * 16
    return min(512, half)


@functools.partial(jax.jit, static_argnames=("out_dtype",))
def network_wrapper_forward(x, v, t, params, out_dtype=jnp.float32):
    """Mirrors NetworkWrapper.forward with mode='so', loss='ssm', norm_out=True."""
    bs = x.shape[0]

    # t = t.squeeze(); if scalar, repeat to (bs,)
    t = jnp.squeeze(t)
    if t.ndim == 0:
        t = jnp.broadcast_to(t, (bs,))
    assert t.ndim == 1 and t.shape[0] == bs
    t2 = t.reshape(bs, 1).astype(jnp.float32)

    # opt.mode == 'so'  ->  flatten x; v is always flattened.
    xf = x.reshape(bs, -1).astype(jnp.float32)
    vf = v.reshape(bs, -1).astype(jnp.float32)

    wx, wv, wt, b1, wo, bo = (params[k] for k in ("wx", "wv", "wt", "b1", "wo", "bo"))
    D = xf.shape[1]
    H = wx.shape[1]

    tm = _pick_tile(bs)
    padded = pl.cdiv(bs, tm) * tm
    if padded != bs:
        pad = padded - bs
        xf = jnp.pad(xf, ((0, pad), (0, 0)))
        vf = jnp.pad(vf, ((0, pad), (0, 0)))
        t2 = jnp.pad(t2, ((0, pad), (0, 0)))

    out = pl.pallas_call(
        _net_wrapper_kernel,
        out_shape=jax.ShapeDtypeStruct((padded, D), out_dtype),
        grid_spec=pltpu.PrefetchScalarGridSpec(
            num_scalar_prefetch=0,
            grid=(padded // tm,),
            in_specs=[
                pl.BlockSpec((tm, D), lambda i: (i, 0)),   # x    (pipelined)
                pl.BlockSpec((tm, D), lambda i: (i, 0)),   # v    (pipelined)
                pl.BlockSpec((tm, 1), lambda i: (i, 0)),   # t    (pipelined)
                pl.BlockSpec((D, H),  lambda i: (0, 0)),   # Wx   (resident)
                pl.BlockSpec((D, H),  lambda i: (0, 0)),   # Wv   (resident)
                pl.BlockSpec((1, H),  lambda i: (0, 0)),   # wt   (resident)
                pl.BlockSpec((1, H),  lambda i: (0, 0)),   # b1   (resident)
                pl.BlockSpec((H, D),  lambda i: (0, 0)),   # Wo   (resident)
                pl.BlockSpec((1, D),  lambda i: (0, 0)),   # bo   (resident)
            ],
            out_specs=pl.BlockSpec((tm, D), lambda i: (i, 0)),
        ),
        compiler_params=pltpu.CompilerParams(
            dimension_semantics=("parallel",),
            # 512-row f32 double-buffered tiles (~14 MB) exceed v5e's 16 MiB
            # scoped default; 32 MiB is safe on every generation's physical VMEM.
            vmem_limit_bytes=32 * 1024 * 1024,
        ),
    )(xf, vf, t2, wx, wv, wt, b1, wo, bo)
    return out[:bs]


def init_params(key, in_dim, hidden_dim):
    ks = jax.random.split(key, 6)
    s_in = 1.0 / math.sqrt(in_dim)
    s_h = 1.0 / math.sqrt(hidden_dim)
    return {
        "wx": (jax.random.normal(ks[0], (in_dim, hidden_dim), jnp.float32)
               * s_in).astype(jnp.bfloat16),
        "wv": (jax.random.normal(ks[1], (in_dim, hidden_dim), jnp.float32)
               * s_in).astype(jnp.bfloat16),
        "wt": jax.random.normal(ks[2], (1, hidden_dim), jnp.float32),
        "b1": jax.random.normal(ks[3], (1, hidden_dim), jnp.float32) * 0.01,
        "wo": (jax.random.normal(ks[4], (hidden_dim, in_dim), jnp.float32)
               * s_h).astype(jnp.bfloat16),
        "bo": jax.random.normal(ks[5], (1, in_dim), jnp.float32) * 0.01,
    }


def _reference(x, v, t, params):
    """Plain-JAX reference following the same bf16-weight / f32-accum path."""
    bs = x.shape[0]
    t = jnp.squeeze(t)
    if t.ndim == 0:
        t = jnp.broadcast_to(t, (bs,))
    t2 = t.reshape(bs, 1).astype(jnp.float32)
    xf = x.reshape(bs, -1).astype(jnp.bfloat16)
    vf = v.reshape(bs, -1).astype(jnp.bfloat16)
    h = (jnp.dot(xf, params["wx"], preferred_element_type=jnp.float32)
         + jnp.dot(vf, params["wv"], preferred_element_type=jnp.float32))
    h = h + t2 * params["wt"] + params["b1"]
    h = jnp.maximum(h, 0.0)
    out = jnp.dot(h.astype(jnp.bfloat16), params["wo"],
                  preferred_element_type=jnp.float32) + params["bo"]
    sigma_t = SIGMA_MIN + t2 * (SIGMA_MAX - SIGMA_MIN)
    norm = sigma_t * _NORM_SCALE
    return out * norm


if __name__ == "__main__":
    B, C, H, W = 2, 4, 16, 16          # x: NCHW, as in PyTorch
    HIDDEN = 128
    D = C * H * W                      # 1024

    key = jax.random.PRNGKey(0)
    kx, kv, kt, kp = jax.random.split(key, 4)
    x = jax.random.normal(kx, (B, C, H, W), jnp.float32)
    v = jax.random.normal(kv, (B, C, H, W), jnp.float32)
    t = jax.random.uniform(kt, (B,), jnp.float32)          # per-sample time in [0,1)
    params = init_params(kp, D, HIDDEN)

    out = network_wrapper_forward(x, v, t, params)
    out = jax.block_until_ready(out)

    ref = _reference(x, v, t, params)
    assert out.shape == (B, D)
    # bf16 weight/activation matmul path -> loosened tolerance vs. f32 original.
    assert jnp.allclose(out, ref, atol=1e-2, rtol=1e-2), "mismatch vs reference"
    print("KERNEL_OK")
</pallas_src>

<mosaic_0001>
module attributes {stable_mosaic.version = 11 : i64} {
  func.func @_net_wrapper_kernel(%arg0: i32, %arg1: memref<16x1024xf32, #tpu.memory_space<vmem>>, %arg2: memref<16x1024xf32, #tpu.memory_space<vmem>>, %arg3: memref<16x1xf32, #tpu.memory_space<vmem>>, %arg4: memref<1024x128xbf16, #tpu.memory_space<vmem>>, %arg5: memref<1024x128xbf16, #tpu.memory_space<vmem>>, %arg6: memref<1x128xf32, #tpu.memory_space<vmem>>, %arg7: memref<1x128xf32, #tpu.memory_space<vmem>>, %arg8: memref<128x1024xbf16, #tpu.memory_space<vmem>>, %arg9: memref<1x1024xf32, #tpu.memory_space<vmem>>, %arg10: memref<16x1024xf32, #tpu.memory_space<vmem>>) attributes {dimension_semantics = [#tpu.dimension_semantics<parallel>], iteration_bounds = array<i64: 1>, scalar_prefetch = 0 : i64, scratch_operands = 0 : i64, tpu.core_type = #tpu.core_type<tc>, window_params = [{transform_indices = @transform_0, window_bounds = array<i64: 16, 1024>}, {transform_indices = @transform_1, window_bounds = array<i64: 16, 1024>}, {transform_indices = @transform_2, window_bounds = array<i64: 16, 1>}, {pipeline_mode = #tpu.pipeline_mode<synchronous>, transform_indices = @transform_3, window_bounds = array<i64: 1024, 128>}, {pipeline_mode = #tpu.pipeline_mode<synchronous>, transform_indices = @transform_4, window_bounds = array<i64: 1024, 128>}, {pipeline_mode = #tpu.pipeline_mode<synchronous>, transform_indices = @transform_5, window_bounds = array<i64: 1, 128>}, {pipeline_mode = #tpu.pipeline_mode<synchronous>, transform_indices = @transform_6, window_bounds = array<i64: 1, 128>}, {pipeline_mode = #tpu.pipeline_mode<synchronous>, transform_indices = @transform_7, window_bounds = array<i64: 128, 1024>}, {pipeline_mode = #tpu.pipeline_mode<synchronous>, transform_indices = @transform_8, window_bounds = array<i64: 1, 1024>}, {transform_indices = @transform_9, window_bounds = array<i64: 16, 1024>}]} {
    %c0 = arith.constant 0 : index
    %c0_0 = arith.constant 0 : index
    %0 = vector.load %arg3[%c0, %c0_0] : memref<16x1xf32, #tpu.memory_space<vmem>>, vector<16x1xf32>
    %c0_1 = arith.constant 0 : index
    %c0_2 = arith.constant 0 : index
    %1 = vector.load %arg1[%c0_1, %c0_2] : memref<16x1024xf32, #tpu.memory_space<vmem>>, vector<16x1024xf32>
    %2 = arith.truncf %1 : vector<16x1024xf32> to vector<16x1024xbf16>
    %c0_3 = arith.constant 0 : index
    %c0_4 = arith.constant 0 : index
    %3 = vector.load %arg2[%c0_3, %c0_4] : memref<16x1024xf32, #tpu.memory_space<vmem>>, vector<16x1024xf32>
    %4 = arith.truncf %3 : vector<16x1024xf32> to vector<16x1024xbf16>
    %c0_5 = arith.constant 0 : index
    %c0_6 = arith.constant 0 : index
    %5 = vector.load %arg4[%c0_5, %c0_6] : memref<1024x128xbf16, #tpu.memory_space<vmem>>, vector<1024x128xbf16>
    %cst = arith.constant dense<0.000000e+00> : vector<16x128xf32>
    %6 = tpu.matmul %2, %5, %cst {dimension_numbers = #tpu.dot_dimension_numbers<[1], [0], [0], [1], [0, 0, 1, 1], [], []>} : vector<16x1024xbf16>, vector<1024x128xbf16>, vector<16x128xf32> -> vector<16x128xf32>
    %c0_7 = arith.constant 0 : index
    %c0_8 = arith.constant 0 : index
    %7 = vector.load %arg5[%c0_7, %c0_8] : memref<1024x128xbf16, #tpu.memory_space<vmem>>, vector<1024x128xbf16>
    %cst_9 = arith.constant dense<0.000000e+00> : vector<16x128xf32>
    %8 = tpu.matmul %4, %7, %cst_9 {dimension_numbers = #tpu.dot_dimension_numbers<[1], [0], [0], [1], [0, 0, 1, 1], [], []>} : vector<16x1024xbf16>, vector<1024x128xbf16>, vector<16x128xf32> -> vector<16x128xf32>
    %9 = arith.addf %6, %8 : vector<16x128xf32>
    %c0_10 = arith.constant 0 : index
    %c0_11 = arith.constant 0 : index
    %10 = vector.load %arg6[%c0_10, %c0_11] : memref<1x128xf32, #tpu.memory_space<vmem>>, vector<1x128xf32>
    %11 = vector.broadcast %0 : vector<16x1xf32> to vector<16x128xf32>
    %12 = vector.broadcast %10 : vector<1x128xf32> to vector<16x128xf32>
    %13 = arith.mulf %11, %12 : vector<16x128xf32>
    %14 = arith.addf %9, %13 : vector<16x128xf32>
    %c0_12 = arith.constant 0 : index
    %c0_13 = arith.constant 0 : index
    %15 = vector.load %arg7[%c0_12, %c0_13] : memref<1x128xf32, #tpu.memory_space<vmem>>, vector<1x128xf32>
    %16 = vector.broadcast %15 : vector<1x128xf32> to vector<16x128xf32>
    %17 = arith.addf %14, %16 : vector<16x128xf32>
    %cst_14 = arith.constant 0.000000e+00 : f32
    %18 = vector.broadcast %cst_14 : f32 to vector<16x128xf32>
    %19 = arith.maximumf %17, %18 : vector<16x128xf32>
    %20 = arith.truncf %19 : vector<16x128xf32> to vector<16x128xbf16>
    %c0_15 = arith.constant 0 : index
    %c0_16 = arith.constant 0 : index
    %21 = vector.load %arg8[%c0_15, %c0_16] : memref<128x1024xbf16, #tpu.memory_space<vmem>>, vector<128x1024xbf16>
    %cst_17 = arith.constant dense<0.000000e+00> : vector<16x1024xf32>
    %22 = tpu.matmul %20, %21, %cst_17 {dimension_numbers = #tpu.dot_dimension_numbers<[1], [0], [0], [1], [0, 0, 1, 1], [], []>} : vector<16x128xbf16>, vector<128x1024xbf16>, vector<16x1024xf32> -> vector<16x1024xf32>
    %c0_18 = arith.constant 0 : index
    %c0_19 = arith.constant 0 : index
    %23 = vector.load %arg9[%c0_18, %c0_19] : memref<1x1024xf32, #tpu.memory_space<vmem>>, vector<1x1024xf32>
    %24 = vector.broadcast %23 : vector<1x1024xf32> to vector<16x1024xf32>
    %25 = arith.addf %22, %24 : vector<16x1024xf32>
    %cst_20 = arith.constant 0.134350285 : f32
    %26 = vector.broadcast %cst_20 : f32 to vector<16x1xf32>
    %27 = arith.mulf %0, %26 : vector<16x1xf32>
    %cst_21 = arith.constant 0.00707106758 : f32
    %28 = vector.broadcast %cst_21 : f32 to vector<16x1xf32>
    %29 = arith.addf %27, %28 : vector<16x1xf32>
    %30 = vector.broadcast %29 : vector<16x1xf32> to vector<16x1024xf32>
    %31 = arith.mulf %25, %30 : vector<16x1024xf32>
    %c0_22 = arith.constant 0 : index
    %c0_23 = arith.constant 0 : index
    %32 = vector.load %arg10[%c0_22, %c0_23] : memref<16x1024xf32, #tpu.memory_space<vmem>>, vector<16x1024xf32>
    tpu.vector_store %arg10[%c0_22, %c0_23], %31 {strides = array<i32>} : memref<16x1024xf32, #tpu.memory_space<vmem>>, vector<16x1024xf32>,
    return
  }
  func.func @transform_0(%arg0: i32) -> (i32, i32) {
    %c0_i32 = arith.constant 0 : i32
    %c0_i32_0 = arith.constant 0 : i32
    return %arg0, %c0_i32 : i32, i32
  }
  func.func @transform_1(%arg0: i32) -> (i32, i32) {
    %c0_i32 = arith.constant 0 : i32
    %c0_i32_0 = arith.constant 0 : i32
    return %arg0, %c0_i32 : i32, i32
  }
  func.func @transform_2(%arg0: i32) -> (i32, i32) {
    %c0_i32 = arith.constant 0 : i32
    %c0_i32_0 = arith.constant 0 : i32
    return %arg0, %c0_i32 : i32, i32
  }
  func.func @transform_3(%arg0: i32) -> (i32, i32) {
    %c0_i32 = arith.constant 0 : i32
    %c0_i32_0 = arith.constant 0 : i32
    %c0_i32_1 = arith.constant 0 : i32
    return %c0_i32, %c0_i32_0 : i32, i32
  }
  func.func @transform_4(%arg0: i32) -> (i32, i32) {
    %c0_i32 = arith.constant 0 : i32
    %c0_i32_0 = arith.constant 0 : i32
    %c0_i32_1 = arith.constant 0 : i32
    return %c0_i32, %c0_i32_0 : i32, i32
  }
  func.func @transform_5(%arg0: i32) -> (i32, i32) {
    %c0_i32 = arith.constant 0 : i32
    %c0_i32_0 = arith.constant 0 : i32
    %c0_i32_1 = arith.constant 0 : i32
    return %c0_i32, %c0_i32_0 : i32, i32
  }
  func.func @transform_6(%arg0: i32) -> (i32, i32) {
    %c0_i32 = arith.constant 0 : i32
    %c0_i32_0 = arith.constant 0 : i32
    %c0_i32_1 = arith.constant 0 : i32
    return %c0_i32, %c0_i32_0 : i32, i32
  }
  func.func @transform_7(%arg0: i32) -> (i32, i32) {
    %c0_i32 = arith.constant 0 : i32
    %c0_i32_0 = arith.constant 0 : i32
    %c0_i32_1 = arith.constant 0 : i32
    return %c0_i32, %c0_i32_0 : i32, i32
  }
  func.func @transform_8(%arg0: i32) -> (i32, i32) {
    %c0_i32 = arith.constant 0 : i32
    %c0_i32_0 = arith.constant 0 : i32
    %c0_i32_1 = arith.constant 0 : i32
    return %c0_i32, %c0_i32_0 : i32, i32
  }
  func.func @transform_9(%arg0: i32) -> (i32, i32) {
    %c0_i32 = arith.constant 0 : i32
    %c0_i32_0 = arith.constant 0 : i32
    return %arg0, %c0_i32 : i32, i32
  }
}

</mosaic_0001>

<bundles_post_ra>
// kernel: network_wrapper_forward.1
= control target key start
LH: loop header
LB: loop body
LE: loop exit
PB: predicated region body
PF: predicated region fallthrough
CT: control target
= control target key end

     0   :  { %14 = vsyncpa [#allocation3], 0  ;;  %s3304_s0 = inlined_call_operand.vmem [shape: f32[16,1024], index: 0, kind: input, shape index: {}]   ;;  %s3305_s1 = inlined_call_operand.vmem [shape: f32[16,1024], index: 1, kind: input, shape index: {}]   ;;  %s3306_s2 = inlined_call_operand.vmem [shape: f32[16,1], index: 2, kind: input, shape index: {}]   ;;  %s3307_s3 = inlined_call_operand.hbm [shape: bf16[1024,128], index: 3, kind: input, shape index: {}]   ;;  %s3308_s4 = inlined_call_operand.hbm [shape: bf16[1024,128], index: 4, kind: input, shape index: {}]   ;;  %s3309_s5 = inlined_call_operand.vmem [shape: f32[1,128], index: 5, kind: input, shape index: {}]   ;;  %s3310_s6 = inlined_call_operand.vmem [shape: f32[1,128], index: 6, kind: input, shape index: {}]   ;;  %s3311_s7 = inlined_call_operand.hbm [shape: bf16[128,1024], index: 7, kind: input, shape index: {}]   ;;  %s3312_s8 = inlined_call_operand.vmem [shape: f32[1,1024], index: 8, kind: input, shape index: {}]   ;;  %s3313_s9 = inlined_call_operand.vmem [shape: f32[16,1024], index: 9, kind: output, shape index: {}]  }
   0x1   :  { %15 = vsyncpa [#allocation5], 0  ;;  %s39_s11 = sshll.u32 %s3308_s4, 4  ;;  %s3018_s12 = smov [#allocation4]   ;;  %s40_s11 = int_to_ptr.hbm [resolvable:$true] %s39_s11 }
   0x2   :  { %s41_s13 = sshll.u32 %s3018_s12, 4  ;;  %s26_s16 = sshll.u32 %s3307_s3, 4  ;;  %s42_s13 = int_to_ptr.vmem [resolvable:$true] %s41_s13  ;;  %s27_s16 = int_to_ptr.hbm [resolvable:$true] %s26_s16 }
   0x3   :  { %s3019_s17 = smov 64   ;;  %s3020_s18 = smov 4  }
   0x4   :  { %47 = dma.hbm_to_vmem [thread:$0]  %s40_s11, 8192, %s42_s13, [#allocation5], %s3019_s17, %s3019_s17, %s3020_s18  }
   0x5   :  { %s3021_s19 = smov [#allocation2]   ;;  %s56_s23 = sshll.u32 %s3311_s7, 4  ;;  %s57_s23 = int_to_ptr.hbm [resolvable:$true] %s56_s23 }
   0x6   :  { %s28_s20 = sshll.u32 %s3021_s19, 4  ;;  %s3022_s4 = smov [#allocation6]   ;;  %s29_s20 = int_to_ptr.vmem [resolvable:$true] %s28_s20 }
   0x7   :  { %34 = dma.hbm_to_vmem [thread:$0]  %s27_s16, 8192, %s29_s20, [#allocation3], %s3019_s17, %s3019_s17, %s3020_s18  }
   0x8   :  { %s58_s24 = sshll.u32 %s3022_s4, 4  ;;  %s3023_s25 = smov 512   ;;  %s59_s24 = int_to_ptr.vmem [resolvable:$true] %s58_s24 }
   0x9   :  { %s3024_s26 = smov 32  }
   0xa   :  { %64 = dma.hbm_to_vmem [thread:$0]  %s57_s23, 8192, %s59_s24, [#allocation5], %s3023_s25, %s3023_s25, %s3024_s26  }
   0xb   :  { %3014 = dma.done.wait [#allocation3], 8192  }
   0xc   :  { %3015 = vsyncadd [#allocation3], 4294959104 }
   0xd   :  { %3016 = dma.done.wait [#allocation5], 16384  }
   0xe   :  { %3017 = vsyncadd [#allocation5], 4294950912  ;;  %v2809_v0 = vld [vmem:[#allocation4 + $0x38] sm:$0xff]  ;;  %v2808_v4 = vld [vmem:[#allocation4 + $0x30] sm:$0xff] }
   0xf   :  { %v2817_v1 = vld [vmem:[#allocation4 + $0x78] sm:$0xff]  ;;  %769 = vmatpush.bf16.msra.mxu0 %v2809_v0  ;;  %v2816_v5 = vld [vmem:[#allocation4 + $0x70] sm:$0xff]  ;;  %v2807_v8 = vld [vmem:[#allocation4 + $0x28] sm:$0xff] }
  0x10   :  { %v2825_v2 = vld [vmem:[#allocation4 + $0xb8] sm:$0xff]  ;;  %783 = vmatpush.bf16.msra.mxu1 %v2817_v1  ;;  %v2824_v6 = vld [vmem:[#allocation4 + $0xb0] sm:$0xff]  ;;  %v2815_v9 = vld [vmem:[#allocation4 + $0x68] sm:$0xff] }
  0x11   :  { %v2833_v3 = vld [vmem:[#allocation4 + $0xf8] sm:$0xff]  ;;  %797 = vmatpush.bf16.msra.mxu2 %v2825_v2  ;;  %v2832_v7 = vld [vmem:[#allocation4 + $0xf0] sm:$0xff]  ;;  %v2823_v10 = vld [vmem:[#allocation4 + $0xa8] sm:$0xff] }
  0x12   :  { %811 = vmatpush.bf16.msra.mxu3 %v2833_v3  ;;  %v2831_v11 = vld [vmem:[#allocation4 + $0xe8] sm:$0xff]  ;;  %v2806_v12 = vld [vmem:[#allocation4 + $0x20] sm:$0xff]  ;;  %v2805_v16 = vld [vmem:[#allocation4 + $0x18] sm:$0xff] }
  0x13   :  { %770 = vmatpush.bf16.msra.mxu0 %v2808_v4  ;;  %v2814_v13 = vld [vmem:[#allocation4 + $0x60] sm:$0xff]  ;;  %v2813_v17 = vld [vmem:[#allocation4 + $0x58] sm:$0xff]  ;;  %v2804_v20 = vld [vmem:[#allocation4 + $0x10] sm:$0xff] }
  0x14   :  { %784 = vmatpush.bf16.msra.mxu1 %v2816_v5  ;;  %v2822_v14 = vld [vmem:[#allocation4 + $0xa0] sm:$0xff]  ;;  %v2821_v18 = vld [vmem:[#allocation4 + $0x98] sm:$0xff]  ;;  %v2812_v21 = vld [vmem:[#allocation4 + $0x50] sm:$0xff] }
  0x15   :  { %798 = vmatpush.bf16.msra.mxu2 %v2824_v6  ;;  %v2830_v15 = vld [vmem:[#allocation4 + $0xe0] sm:$0xff]  ;;  %v2829_v19 = vld [vmem:[#allocation4 + $0xd8] sm:$0xff]  ;;  %v2820_v22 = vld [vmem:[#allocation4 + $0x90] sm:$0xff] }
  0x16   :  { %812 = vmatpush.bf16.msra.mxu3 %v2832_v7  ;;  %v2828_v23 = vld [vmem:[#allocation4 + $0xd0] sm:$0xff]  ;;  %v2803_v24 = vld [vmem:[#allocation4 + $0x8] sm:$0xff]  ;;  %v2802_v28 = vld [vmem:[#allocation4] sm:$0xff] }
  0x17   :  { %771 = vmatpush.bf16.msra.mxu0 %v2807_v8  ;;  %v2811_v25 = vld [vmem:[#allocation4 + $0x48] sm:$0xff]  ;;  %v2810_v29 = vld [vmem:[#allocation4 + $0x40] sm:$0xff]  ;;  %v2841_v32 = vld [vmem:[#allocation4 + $0x138] sm:$0xff] }
  0x18   :  { %785 = vmatpush.bf16.msra.mxu1 %v2815_v9  ;;  %v2819_v26 = vld [vmem:[#allocation4 + $0x88] sm:$0xff]  ;;  %v2818_v30 = vld [vmem:[#allocation4 + $0x80] sm:$0xff]  ;;  %v2849_v33 = vld [vmem:[#allocation4 + $0x178] sm:$0xff] }
  0x19   :  { %799 = vmatpush.bf16.msra.mxu2 %v2823_v10  ;;  %v2827_v27 = vld [vmem:[#allocation4 + $0xc8] sm:$0xff]  ;;  %v2826_v31 = vld [vmem:[#allocation4 + $0xc0] sm:$0xff]  ;;  %v107_v36 = vld [vmem:[%s3305_s1 + $0x10] sm:$0xff] }
  0x1a   :  { %813 = vmatpush.bf16.msra.mxu3 %v2831_v11  ;;  %v105_v34 = vld [vmem:[%s3305_s1] sm:$0xff]  ;;  %v115_v37 = vld [vmem:[%s3305_s1 + $0x50] sm:$0xff]  ;;  %v106_v38 = vld [vmem:[%s3305_s1 + $0x8] sm:$0xff] }
  0x1b   :  { %772 = vmatpush.bf16.msra.mxu0 %v2806_v12  ;;  %v113_v35 = vld [vmem:[%s3305_s1 + $0x40] sm:$0xff]  ;;  %v114_v39 = vld [vmem:[%s3305_s1 + $0x48] sm:$0xff]  ;;  %v108_v40 = vld [vmem:[%s3305_s1 + $0x18] sm:$0xff]  ;;  %v123_v45 = vpack.c.bf16 %v115_v37, %v107_v36 }
  0x1c   :  { %786 = vmatpush.bf16.msra.mxu1 %v2814_v13  ;;  %v116_v41 = vld [vmem:[%s3305_s1 + $0x58] sm:$0xff]  ;;  %v121_v44 = vpack.c.bf16 %v113_v35, %v105_v34  ;;  %v122_v46 = vpack.c.bf16 %v114_v39, %v106_v38  ;;  %v2840_v48 = vld [vmem:[#allocation4 + $0x130] sm:$0xff]  ;;  %v2839_v52 = vld [vmem:[#allocation4 + $0x128] sm:$0xff] }
  0x1d   :  { %800 = vmatpush.bf16.msra.mxu2 %v2822_v14  ;;  %v2857_v42 = vld [vmem:[#allocation4 + $0x1b8] sm:$0xff]  ;;  %v124_v47 = vpack.c.bf16 %v116_v41, %v108_v40  ;;  %v2848_v49 = vld [vmem:[#allocation4 + $0x170] sm:$0xff]  ;;  %v2847_v53 = vld [vmem:[#allocation4 + $0x168] sm:$0xff] }
  0x1e   :  { %814 = vmatpush.bf16.msra.mxu3 %v2830_v15  ;;  %v2865_v43 = vld [vmem:[#allocation4 + $0x1f8] sm:$0xff]  ;;  %v2856_v50 = vld [vmem:[#allocation4 + $0x1b0] sm:$0xff]  ;;  %v2855_v54 = vld [vmem:[#allocation4 + $0x1a8] sm:$0xff] }
  0x1f   :  { %773 = vmatpush.bf16.msra.mxu0 %v2805_v16  ;;  %v2864_v51 = vld [vmem:[#allocation4 + $0x1f0] sm:$0xff]  ;;  %v2863_v55 = vld [vmem:[#allocation4 + $0x1e8] sm:$0xff]  ;;  %v2838_v56 = vld [vmem:[#allocation4 + $0x120] sm:$0xff] }
  0x20   :  { %787 = vmatpush.bf16.msra.mxu1 %v2813_v17  ;;  %v2846_v57 = vld [vmem:[#allocation4 + $0x160] sm:$0xff]  ;;  %v2837_v60 = vld [vmem:[#allocation4 + $0x118] sm:$0xff]  ;;  %v2836_v0 = vld [vmem:[#allocation4 + $0x110] sm:$0xff] }
  0x21   :  { %801 = vmatpush.bf16.msra.mxu2 %v2821_v18  ;;  %v2854_v58 = vld [vmem:[#allocation4 + $0x1a0] sm:$0xff]  ;;  %v2845_v61 = vld [vmem:[#allocation4 + $0x158] sm:$0xff]  ;;  %v2844_v1 = vld [vmem:[#allocation4 + $0x150] sm:$0xff] }
  0x22   :  { %815 = vmatpush.bf16.msra.mxu3 %v2829_v19  ;;  %v2862_v59 = vld [vmem:[#allocation4 + $0x1e0] sm:$0xff]  ;;  %v2853_v62 = vld [vmem:[#allocation4 + $0x198] sm:$0xff]  ;;  %v2852_v2 = vld [vmem:[#allocation4 + $0x190] sm:$0xff] }
  0x23   :  { %774 = vmatpush.bf16.msra.mxu0 %v2804_v20  ;;  %v2861_v63 = vld [vmem:[#allocation4 + $0x1d8] sm:$0xff]  ;;  %v2860_v3 = vld [vmem:[#allocation4 + $0x1d0] sm:$0xff]  ;;  %v2835_v4 = vld [vmem:[#allocation4 + $0x108] sm:$0xff] }
  0x24   :  { %788 = vmatpush.bf16.msra.mxu1 %v2812_v21  ;;  %v2843_v5 = vld [vmem:[#allocation4 + $0x148] sm:$0xff]  ;;  %v2834_v8 = vld [vmem:[#allocation4 + $0x100] sm:$0xff]  ;;  %v2745_v12 = vld [vmem:[#allocation2 + $0x38] sm:$0xff] }
  0x25   :  { %802 = vmatpush.bf16.msra.mxu2 %v2820_v22  ;;  %v2851_v6 = vld [vmem:[#allocation4 + $0x188] sm:$0xff]  ;;  %v2842_v9 = vld [vmem:[#allocation4 + $0x140] sm:$0xff]  ;;  %v2753_v13 = vld [vmem:[#allocation2 + $0x78] sm:$0xff] }
  0x26   :  { %816 = vmatpush.bf16.msra.mxu3 %v2828_v23  ;;  %v2859_v7 = vld [vmem:[#allocation4 + $0x1c8] sm:$0xff]  ;;  %v2850_v10 = vld [vmem:[#allocation4 + $0x180] sm:$0xff]  ;;  %v111_v16 = vld [vmem:[%s3305_s1 + $0x30] sm:$0xff] }
  0x27   :  { %775 = vmatpush.bf16.msra.mxu0 %v2803_v24  ;;  %v2858_v11 = vld [vmem:[#allocation4 + $0x1c0] sm:$0xff]  ;;  %v119_v17 = vld [vmem:[%s3305_s1 + $0x70] sm:$0xff]  ;;  %v110_v18 = vld [vmem:[%s3305_s1 + $0x28] sm:$0xff] }
  0x28   :  { %789 = vmatpush.bf16.msra.mxu1 %v2811_v25  ;;  %v109_v14 = vld [vmem:[%s3305_s1 + $0x20] sm:$0xff]  ;;  %v118_v19 = vld [vmem:[%s3305_s1 + $0x68] sm:$0xff]  ;;  %v112_v20 = vld [vmem:[%s3305_s1 + $0x38] sm:$0xff]  ;;  %v127_v25 = vpack.c.bf16 %v119_v17, %v111_v16  ;;  %v3025_v17 = vmov 0  }
  0x29   :  { %803 = vmatpush.bf16.msra.mxu2 %v2819_v26  ;;  %v117_v15 = vld [vmem:[%s3305_s1 + $0x60] sm:$0xff]  ;;  %v120_v21 = vld [vmem:[%s3305_s1 + $0x78] sm:$0xff]  ;;  %v126_v26 = vpack.c.bf16 %v118_v19, %v110_v18  ;;  %v2759_v34 = vld [vmem:[#allocation2 + $0xa8] sm:$0xff]  ;;  %2938 = vset.pattern.permute.xlu0 %v3025_v17 }
  0x2a   :  { %817 = vmatpush.bf16.msra.mxu3 %v2827_v27  ;;  %v2761_v22 = vld [vmem:[#allocation2 + $0xb8] sm:$0xff]  ;;  %v125_v24 = vpack.c.bf16 %v117_v15, %v109_v14  ;;  %v128_v27 = vpack.c.bf16 %v120_v21, %v112_v20  ;;  %v2767_v35 = vld [vmem:[#allocation2 + $0xe8] sm:$0xff]  ;;  %v2742_v36 = vld [vmem:[#allocation2 + $0x20] sm:$0xff]  ;;  %2939 = vset.pattern.permute.xlu1 %v3025_v17 }
  0x2b   :  { %776 = vmatpush.bf16.msra.mxu0 %v2802_v28  ;;  %v2769_v23 = vld [vmem:[#allocation2 + $0xf8] sm:$0xff]  ;;  %v2744_v28 = vld [vmem:[#allocation2 + $0x30] sm:$0xff]  ;;  %v2750_v37 = vld [vmem:[#allocation2 + $0x60] sm:$0xff] }
  0x2c   :  { %790 = vmatpush.bf16.msra.mxu1 %v2810_v29  ;;  %v2752_v29 = vld [vmem:[#allocation2 + $0x70] sm:$0xff]  ;;  %v2758_v38 = vld [vmem:[#allocation2 + $0xa0] sm:$0xff]  ;;  %v2741_v40 = vld [vmem:[#allocation2 + $0x18] sm:$0xff] }
  0x2d   :  { %804 = vmatpush.bf16.msra.mxu2 %v2818_v30  ;;  %v2760_v30 = vld [vmem:[#allocation2 + $0xb0] sm:$0xff]  ;;  %v2766_v39 = vld [vmem:[#allocation2 + $0xe0] sm:$0xff]  ;;  %v2749_v41 = vld [vmem:[#allocation2 + $0x58] sm:$0xff] }
  0x2e   :  { %818 = vmatpush.bf16.msra.mxu3 %v2826_v31  ;;  %777 = vmatmul.bf16.vlgmr.msra.gmra.mxu0 %v121_v44  ;;  %v2768_v31 = vld [vmem:[#allocation2 + $0xf0] sm:$0xff]  ;;  %v3160_v14 = vld [vmem:[%s3306_s2] sm:$0xff]  ;;  %v2791_v15 = vld [vmem:[#allocation2 + $0x1a8] sm:$0xff] }
  0x2f   :  { %825 = vmatpush.bf16.msrb.mxu0 %v2841_v32  ;;  %791 = vmatmul.bf16.vlgmr.msra.gmra.mxu1 %v122_v46  ;;  %v2743_v32 = vld [vmem:[#allocation2 + $0x28] sm:$0xff]  ;;  %v2740_v44 = vld [vmem:[#allocation2 + $0x10] sm:$0xff]  ;;  %v2774_v18 = vld [vmem:[#allocation2 + $0x120] sm:$0xff] }
  0x30   :  { %839 = vmatpush.bf16.msrb.mxu1 %v2849_v33  ;;  %805 = vmatmul.bf16.vlgmr.msra.gmra.mxu2 %v123_v45  ;;  %v2751_v33 = vld [vmem:[#allocation2 + $0x68] sm:$0xff]  ;;  %v2748_v45 = vld [vmem:[#allocation2 + $0x50] sm:$0xff]  ;;  %v2782_v19 = vld [vmem:[#allocation2 + $0x160] sm:$0xff] }
  0x31   :  { %853 = vmatpush.bf16.msrb.mxu2 %v2857_v42  ;;  %819 = vmatmul.bf16.vlgmr.msra.gmra.mxu3 %v124_v47  ;;  %v2757_v42 = vld [vmem:[#allocation2 + $0x98] sm:$0xff]  ;;  %v2756_v46 = vld [vmem:[#allocation2 + $0x90] sm:$0xff]  ;;  %v2799_v16 = vld [vmem:[#allocation2 + $0x1e8] sm:$0xff] }
  0x32   :  { %867 = vmatpush.bf16.msrb.mxu3 %v2865_v43  ;;  %v2765_v43 = vld [vmem:[#allocation2 + $0xd8] sm:$0xff]  ;;  %v2764_v47 = vld [vmem:[#allocation2 + $0xd0] sm:$0xff]  ;;  %1380 = vperm.xlu0 %2938, %v3160_v14   ;;  %v2790_v20 = vld [vmem:[#allocation2 + $0x1a0] sm:$0xff] }
  0x33   :  { %826 = vmatpush.bf16.msrb.mxu0 %v2840_v48  ;;  %v2739_v48 = vld [vmem:[#allocation2 + $0x8] sm:$0xff]  ;;  %v2798_v21 = vld [vmem:[#allocation2 + $0x1e0] sm:$0xff] }
  0x34   :  { %840 = vmatpush.bf16.msrb.mxu1 %v2848_v49  ;;  %v2747_v49 = vld [vmem:[#allocation2 + $0x48] sm:$0xff]  ;;  %v2644_v17 = vld [vmem:[#allocation6 + $0x140] sm:$0xf] }
  0x35   :  { %854 = vmatpush.bf16.msrb.mxu2 %v2856_v50  ;;  %v2755_v50 = vld [vmem:[#allocation2 + $0x88] sm:$0xff] }
  0x36   :  { %868 = vmatpush.bf16.msrb.mxu3 %v2864_v51  ;;  %v2763_v51 = vld [vmem:[#allocation2 + $0xc8] sm:$0xff] }
  0x37   :  { %827 = vmatpush.bf16.msrb.mxu0 %v2839_v52  ;;  %v2738_v52 = vld [vmem:[#allocation2] sm:$0xff] }
  0x38   :  { %841 = vmatpush.bf16.msrb.mxu1 %v2847_v53  ;;  %v2746_v53 = vld [vmem:[#allocation2 + $0x40] sm:$0xff] }
  0x39   :  { %855 = vmatpush.bf16.msrb.mxu2 %v2855_v54  ;;  %v2754_v54 = vld [vmem:[#allocation2 + $0x80] sm:$0xff] }
  0x3a   :  { %869 = vmatpush.bf16.msrb.mxu3 %v2863_v55  ;;  %v2762_v55 = vld [vmem:[#allocation2 + $0xc0] sm:$0xff] }
  0x3b   :  { %828 = vmatpush.bf16.msrb.mxu0 %v2838_v56  ;;  %v2777_v56 = vld [vmem:[#allocation2 + $0x138] sm:$0xff] }
  0x3c   :  { %842 = vmatpush.bf16.msrb.mxu1 %v2846_v57  ;;  %v2785_v57 = vld [vmem:[#allocation2 + $0x178] sm:$0xff] }
  0x3d   :  { %856 = vmatpush.bf16.msrb.mxu2 %v2854_v58  ;;  %v81_v58 = vld [vmem:[%s3304_s0] sm:$0xff] }
  0x3e   :  { %870 = vmatpush.bf16.msrb.mxu3 %v2862_v59  ;;  %v89_v59 = vld [vmem:[%s3304_s0 + $0x40] sm:$0xff] }
  0x3f   :  { %829 = vmatpush.bf16.msrb.mxu0 %v2837_v60  ;;  %v83_v60 = vld [vmem:[%s3304_s0 + $0x10] sm:$0xff] }
  0x40   :  { %843 = vmatpush.bf16.msrb.mxu1 %v2845_v61  ;;  %v91_v61 = vld [vmem:[%s3304_s0 + $0x50] sm:$0xff] }
  0x41   :  { %857 = vmatpush.bf16.msrb.mxu2 %v2853_v62  ;;  %v82_v62 = vld [vmem:[%s3304_s0 + $0x8] sm:$0xff] }
  0x42   :  { %871 = vmatpush.bf16.msrb.mxu3 %v2861_v63  ;;  %v90_v63 = vld [vmem:[%s3304_s0 + $0x48] sm:$0xff] }
  0x43   :  { %830 = vmatpush.bf16.msrb.mxu0 %v2836_v0  ;;  %v84_v0 = vld [vmem:[%s3304_s0 + $0x18] sm:$0xff] }
  0x44   :  { %844 = vmatpush.bf16.msrb.mxu1 %v2844_v1  ;;  %v92_v1 = vld [vmem:[%s3304_s0 + $0x58] sm:$0xff] }
  0x45   :  { %858 = vmatpush.bf16.msrb.mxu2 %v2852_v2  ;;  %v2793_v2 = vld [vmem:[#allocation2 + $0x1b8] sm:$0xff] }
  0x46   :  { %872 = vmatpush.bf16.msrb.mxu3 %v2860_v3  ;;  %v2801_v3 = vld [vmem:[#allocation2 + $0x1f8] sm:$0xff] }
  0x47   :  { %831 = vmatpush.bf16.msrb.mxu0 %v2835_v4  ;;  %v97_v4 = vpack.c.bf16 %v89_v59, %v81_v58  ;;  %v2716_v58 = vld [vmem:[#allocation6 + $0x1c8] sm:$0xf] }
  0x48   :  { %845 = vmatpush.bf16.msrb.mxu1 %v2843_v5  ;;  %v99_v5 = vpack.c.bf16 %v91_v61, %v83_v60  ;;  %v2927_v59 = vld [vmem:[#allocation6 + $0x1e4] sm:$0xf0] }
  0x49   :  { %859 = vmatpush.bf16.msrb.mxu2 %v2851_v6  ;;  %v98_v6 = vpack.c.bf16 %v90_v63, %v82_v62  ;;  %v2717_v63 = vor.u32 %v2927_v59, %v2716_v58 }
  0x4a   :  { %873 = vmatpush.bf16.msrb.mxu3 %v2859_v7  ;;  %v100_v7 = vpack.c.bf16 %v92_v1, %v84_v0  ;;  %v2923_v0 = vld [vmem:[#allocation6 + $0x1cc] sm:$0xf] }
  0x4b   :  { %832 = vmatpush.bf16.msrb.mxu0 %v2834_v8  ;;  %v2776_v8 = vld [vmem:[#allocation2 + $0x130] sm:$0xff]  ;;  %v2718_v1 = vld [vmem:[#allocation6 + $0x1e8] sm:$0xf0] }
  0x4c   :  { %846 = vmatpush.bf16.msrb.mxu1 %v2842_v9  ;;  %v2784_v9 = vld [vmem:[#allocation2 + $0x170] sm:$0xff] }
  0x4d   :  { %860 = vmatpush.bf16.msrb.mxu2 %v2850_v10  ;;  %v2792_v10 = vld [vmem:[#allocation2 + $0x1b0] sm:$0xff] }
  0x4e   :  { %874 = vmatpush.bf16.msrb.mxu3 %v2858_v11  ;;  %833 = vmatmul.bf16.vlgmr.msrb.gmra.mxu0 %v125_v24  ;;  %v2800_v11 = vld [vmem:[#allocation2 + $0x1f0] sm:$0xff]  ;;  %v3166_v24 = vld [vmem:[%s3306_s2 + $0x8] sm:$0xff] }
  0x4f   :  { %1265 = vmatpush.bf16.msra.mxu0 %v2745_v12  ;;  %847 = vmatmul.bf16.vlgmr.msrb.gmra.mxu1 %v126_v26  ;;  %v2775_v12 = vld [vmem:[#allocation2 + $0x128] sm:$0xff]  ;;  %v2797_v26 = vld [vmem:[#allocation2 + $0x1d8] sm:$0xff] }
  0x50   :  { %1279 = vmatpush.bf16.msra.mxu1 %v2753_v13  ;;  %861 = vmatmul.bf16.vlgmr.msrb.gmra.mxu2 %v127_v25  ;;  %v2783_v13 = vld [vmem:[#allocation2 + $0x168] sm:$0xff]  ;;  %v2789_v25 = vld [vmem:[#allocation2 + $0x198] sm:$0xff] }
  0x51   :  { %1293 = vmatpush.bf16.msra.mxu2 %v2761_v22  ;;  %875 = vmatmul.bf16.vlgmr.msrb.gmra.mxu3 %v128_v27  ;;  %v2773_v22 = vld [vmem:[#allocation2 + $0x118] sm:$0xff]  ;;  %v2772_v27 = vld [vmem:[#allocation2 + $0x110] sm:$0xff] }
  0x52   :  { %1307 = vmatpush.bf16.msra.mxu3 %v2769_v23  ;;  %v2781_v23 = vld [vmem:[#allocation2 + $0x158] sm:$0xff]  ;;  %1385 = vperm.xlu0 %2938, %v3166_v24  }
  0x53   :  { %1266 = vmatpush.bf16.msra.mxu0 %v2744_v28  ;;  %v2780_v28 = vld [vmem:[#allocation2 + $0x150] sm:$0xff] }
  0x54   :  { %1280 = vmatpush.bf16.msra.mxu1 %v2752_v29  ;;  %v2788_v29 = vld [vmem:[#allocation2 + $0x190] sm:$0xff] }
  0x55   :  { %1294 = vmatpush.bf16.msra.mxu2 %v2760_v30  ;;  %v2796_v30 = vld [vmem:[#allocation2 + $0x1d0] sm:$0xff] }
  0x56   :  { %1308 = vmatpush.bf16.msra.mxu3 %v2768_v31  ;;  %v2771_v31 = vld [vmem:[#allocation2 + $0x108] sm:$0xff] }
  0x57   :  { %1267 = vmatpush.bf16.msra.mxu0 %v2743_v32  ;;  %v2779_v32 = vld [vmem:[#allocation2 + $0x148] sm:$0xff] }
  0x58   :  { %1281 = vmatpush.bf16.msra.mxu1 %v2751_v33  ;;  %v2787_v33 = vld [vmem:[#allocation2 + $0x188] sm:$0xff] }
  0x59   :  { %1295 = vmatpush.bf16.msra.mxu2 %v2759_v34  ;;  %v2795_v34 = vld [vmem:[#allocation2 + $0x1c8] sm:$0xff] }
  0x5a   :  { %1309 = vmatpush.bf16.msra.mxu3 %v2767_v35  ;;  %v2770_v35 = vld [vmem:[#allocation2 + $0x100] sm:$0xff] }
  0x5b   :  { %1268 = vmatpush.bf16.msra.mxu0 %v2742_v36  ;;  %v2778_v36 = vld [vmem:[#allocation2 + $0x140] sm:$0xff] }
  0x5c   :  { %1282 = vmatpush.bf16.msra.mxu1 %v2750_v37  ;;  %v2786_v37 = vld [vmem:[#allocation2 + $0x180] sm:$0xff] }
  0x5d   :  { %1296 = vmatpush.bf16.msra.mxu2 %v2758_v38  ;;  %v2794_v38 = vld [vmem:[#allocation2 + $0x1c0] sm:$0xff] }
  0x5e   :  { %1310 = vmatpush.bf16.msra.mxu3 %v2766_v39  ;;  %v85_v39 = vld [vmem:[%s3304_s0 + $0x20] sm:$0xff] }
  0x5f   :  { %1269 = vmatpush.bf16.msra.mxu0 %v2741_v40  ;;  %v93_v40 = vld [vmem:[%s3304_s0 + $0x60] sm:$0xff] }
  0x60   :  { %1283 = vmatpush.bf16.msra.mxu1 %v2749_v41  ;;  %v86_v41 = vld [vmem:[%s3304_s0 + $0x28] sm:$0xff] }
  0x61   :  { %1297 = vmatpush.bf16.msra.mxu2 %v2757_v42  ;;  %v94_v42 = vld [vmem:[%s3304_s0 + $0x68] sm:$0xff] }
  0x62   :  { %1311 = vmatpush.bf16.msra.mxu3 %v2765_v43  ;;  %v87_v43 = vld [vmem:[%s3304_s0 + $0x30] sm:$0xff] }
  0x63   :  { %1270 = vmatpush.bf16.msra.mxu0 %v2740_v44  ;;  %v95_v44 = vld [vmem:[%s3304_s0 + $0x70] sm:$0xff] }
  0x64   :  { %1284 = vmatpush.bf16.msra.mxu1 %v2748_v45  ;;  %v88_v45 = vld [vmem:[%s3304_s0 + $0x38] sm:$0xff] }
  0x65   :  { %1298 = vmatpush.bf16.msra.mxu2 %v2756_v46  ;;  %v96_v46 = vld [vmem:[%s3304_s0 + $0x78] sm:$0xff] }
  0x66   :  { %1312 = vmatpush.bf16.msra.mxu3 %v2764_v47  ;;  %v101_v47 = vpack.c.bf16 %v93_v40, %v85_v39 }
  0x67   :  { %1271 = vmatpush.bf16.msra.mxu0 %v2739_v48  ;;  %v102_v48 = vpack.c.bf16 %v94_v42, %v86_v41 }
  0x68   :  { %1285 = vmatpush.bf16.msra.mxu1 %v2747_v49  ;;  %v103_v49 = vpack.c.bf16 %v95_v44, %v87_v43  ;;  %v2622_v43 = vld [vmem:[#allocation6 + $0x128] sm:$0xf0]  ;;  %v2580_v44 = vld [vmem:[#allocation6 + $0xc0] sm:$0xf] }
  0x69   :  { %1299 = vmatpush.bf16.msra.mxu2 %v2755_v50  ;;  %v104_v50 = vpack.c.bf16 %v96_v46, %v88_v45  ;;  %v2894_v45 = vld [vmem:[#allocation6 + $0xdc] sm:$0xf0] }
  0x6a   :  { %1313 = vmatpush.bf16.msra.mxu3 %v2763_v51 }
  0x6b   :  { %1272 = vmatpush.bf16.msra.mxu0 %v2738_v52 }
  0x6c   :  { %1286 = vmatpush.bf16.msra.mxu1 %v2746_v53  ;;  %v2708_v53 = vld [vmem:[#allocation6 + $0x1c0] sm:$0xf] }
  0x6d   :  { %1300 = vmatpush.bf16.msra.mxu2 %v2754_v54  ;;  %v2926_v54 = vld [vmem:[#allocation6 + $0x1dc] sm:$0xf0] }
  0x6e   :  { %1314 = vmatpush.bf16.msra.mxu3 %v2762_v55  ;;  %1273 = vmatmul.bf16.vlgmr.msra.gmra.mxu0 %v97_v4  ;;  %v2922_v55 = vld [vmem:[#allocation6 + $0x1c4] sm:$0xf]  ;;  %v2918_v4 = vld [vmem:[#allocation6 + $0x19c] sm:$0xf0] }
  0x6f   :  { %1321 = vmatpush.bf16.msrb.mxu0 %v2777_v56  ;;  %1287 = vmatmul.bf16.vlgmr.msra.gmra.mxu1 %v98_v6  ;;  %v2709_v56 = vor.u32 %v2926_v54, %v2708_v53  ;;  %v2891_v53 = vld [vmem:[#allocation6 + $0xcc] sm:$0xf] }
  0x70   :  { %1335 = vmatpush.bf16.msrb.mxu1 %v2785_v57  ;;  %1301 = vmatmul.bf16.vlgmr.msra.gmra.mxu2 %v99_v5  ;;  %v2710_v57 = vld [vmem:[#allocation6 + $0x1e0] sm:$0xf0]  ;;  %v2590_v54 = vld [vmem:[#allocation6 + $0xe8] sm:$0xf0] }
  0x71   :  { %1349 = vmatpush.bf16.msrb.mxu2 %v2793_v2  ;;  %1315 = vmatmul.bf16.vlgmr.msra.gmra.mxu3 %v100_v7  ;;  %v2713_v62 = vor.u32 %v2922_v55, %v2710_v57  ;;  %v2721_v2 = vor.u32 %v2923_v0, %v2718_v1  ;;  %v2914_v5 = vld [vmem:[#allocation6 + $0x184] sm:$0xf]  ;;  %v2581_v57 = vor.u32 %v2894_v45, %v2580_v44  ;;  %v2548_v1 = vld [vmem:[#allocation6 + $0x80] sm:$0xf]  ;;  %v2724_v44 = vld [vmem:[#allocation6 + $0x1d0] sm:$0xf] }
  0x72   :  { %1363 = vmatpush.bf16.msrb.mxu3 %v2801_v3  ;;  %v2676_v3 = vld [vmem:[#allocation6 + $0x180] sm:$0xf] }
  0x73   :  { %1322 = vmatpush.bf16.msrb.mxu0 %v2776_v8  ;;  %v2677_v7 = vor.u32 %v2918_v4, %v2676_v3  ;;  %v2678_v8 = vld [vmem:[#allocation6 + $0x1a0] sm:$0xf0]  ;;  %v2556_v4 = vld [vmem:[#allocation6 + $0x88] sm:$0xf] }
  0x74   :  { %1336 = vmatpush.bf16.msrb.mxu1 %v2784_v9  ;;  %v2684_v9 = vld [vmem:[#allocation6 + $0x188] sm:$0xf]  ;;  %v2882_v3 = vld [vmem:[#allocation6 + $0x84] sm:$0xf] }
  0x75   :  { %1350 = vmatpush.bf16.msrb.mxu2 %v2792_v10  ;;  %v2919_v10 = vld [vmem:[#allocation6 + $0x1a4] sm:$0xf0] }
  0x76   :  { %1364 = vmatpush.bf16.msrb.mxu3 %v2800_v11  ;;  %v2681_v11 = vor.u32 %v2914_v5, %v2678_v8  ;;  %v2887_v5 = vld [vmem:[#allocation6 + $0xa4] sm:$0xf0] }
  0x77   :  { %1323 = vmatpush.bf16.msrb.mxu0 %v2775_v12  ;;  %v2685_v12 = vor.u32 %v2919_v10, %v2684_v9  ;;  %v2557_v10 = vor.u32 %v2887_v5, %v2556_v4 }
  0x78   :  { %1337 = vmatpush.bf16.msrb.mxu1 %v2783_v13  ;;  %v2915_v13 = vld [vmem:[#allocation6 + $0x18c] sm:$0xf] }
  0x79   :  { %1351 = vmatpush.bf16.msrb.mxu2 %v2791_v15  ;;  %v2686_v15 = vld [vmem:[#allocation6 + $0x1a8] sm:$0xf0] }
  0x7a   :  { %1365 = vmatpush.bf16.msrb.mxu3 %v2799_v16  ;;  %v2689_v16 = vor.u32 %v2915_v13, %v2686_v15  ;;  %v2516_v15 = vld [vmem:[#allocation6 + $0x40] sm:$0xf] }
  0x7b   :  { %1324 = vmatpush.bf16.msrb.mxu0 %v2774_v18  ;;  %v2910_v18 = vld [vmem:[#allocation6 + $0x15c] sm:$0xf0] }
  0x7c   :  { %1338 = vmatpush.bf16.msrb.mxu1 %v2782_v19  ;;  %v2906_v19 = vld [vmem:[#allocation6 + $0x144] sm:$0xf] }
  0x7d   :  { %1352 = vmatpush.bf16.msrb.mxu2 %v2790_v20 }
  0x7e   :  { %1366 = vmatpush.bf16.msrb.mxu3 %v2798_v21  ;;  %v2645_v21 = vor.u32 %v2910_v18, %v2644_v17  ;;  %v2874_v17 = vld [vmem:[#allocation6 + $0x44] sm:$0xf] }
  0x7f   :  { %1325 = vmatpush.bf16.msrb.mxu0 %v2773_v22  ;;  %v2646_v22 = vld [vmem:[#allocation6 + $0x160] sm:$0xf0] }
  0x80   :  { %1339 = vmatpush.bf16.msrb.mxu1 %v2781_v23  ;;  %v2652_v23 = vld [vmem:[#allocation6 + $0x148] sm:$0xf] }
  0x81   :  { %1353 = vmatpush.bf16.msrb.mxu2 %v2789_v25  ;;  %v2911_v25 = vld [vmem:[#allocation6 + $0x164] sm:$0xf0] }
  0x82   :  { %1367 = vmatpush.bf16.msrb.mxu3 %v2797_v26  ;;  %v2649_v26 = vor.u32 %v2906_v19, %v2646_v22  ;;  %v2524_v22 = vld [vmem:[#allocation6 + $0x48] sm:$0xf] }
  0x83   :  { %1326 = vmatpush.bf16.msrb.mxu0 %v2772_v27  ;;  %v2653_v27 = vor.u32 %v2911_v25, %v2652_v23  ;;  %v2879_v23 = vld [vmem:[#allocation6 + $0x64] sm:$0xf0] }
  0x84   :  { %1340 = vmatpush.bf16.msrb.mxu1 %v2780_v28  ;;  %v2907_v28 = vld [vmem:[#allocation6 + $0x14c] sm:$0xf] }
  0x85   :  { %1354 = vmatpush.bf16.msrb.mxu2 %v2788_v29  ;;  %v2654_v29 = vld [vmem:[#allocation6 + $0x168] sm:$0xf0] }
  0x86   :  { %1368 = vmatpush.bf16.msrb.mxu3 %v2796_v30  ;;  %v2612_v30 = vld [vmem:[#allocation6 + $0x100] sm:$0xf] }
  0x87   :  { %1327 = vmatpush.bf16.msrb.mxu0 %v2771_v31  ;;  %v2657_v31 = vor.u32 %v2907_v28, %v2654_v29  ;;  %v2526_v28 = vld [vmem:[#allocation6 + $0x68] sm:$0xf0] }
  0x88   :  { %1341 = vmatpush.bf16.msrb.mxu1 %v2779_v32  ;;  %v2902_v32 = vld [vmem:[#allocation6 + $0x11c] sm:$0xf0] }
  0x89   :  { %1355 = vmatpush.bf16.msrb.mxu2 %v2787_v33  ;;  %v2898_v33 = vld [vmem:[#allocation6 + $0x104] sm:$0xf] }
  0x8a   :  { %1369 = vmatpush.bf16.msrb.mxu3 %v2795_v34  ;;  %v2614_v34 = vld [vmem:[#allocation6 + $0x120] sm:$0xf0] }
  0x8b   :  { %1328 = vmatpush.bf16.msrb.mxu0 %v2770_v35  ;;  %v2613_v35 = vor.u32 %v2902_v32, %v2612_v30  ;;  %v2617_v41 = vor.u32 %v2898_v33, %v2614_v34  ;;  %v2484_v32 = vld [vmem:[#allocation6] sm:$0xf]  ;;  %v2866_v34 = vld [vmem:[#allocation6 + $0x4] sm:$0xf] }
  0x8c   :  { %1342 = vmatpush.bf16.msrb.mxu1 %v2778_v36  ;;  %v2620_v36 = vld [vmem:[#allocation6 + $0x108] sm:$0xf]  ;;  %v2870_v33 = vld [vmem:[#allocation6 + $0x1c] sm:$0xf0] }
  0x8d   :  { %1356 = vmatpush.bf16.msrb.mxu2 %v2786_v37  ;;  %v2903_v37 = vld [vmem:[#allocation6 + $0x124] sm:$0xf0] }
  0x8e   :  { %1370 = vmatpush.bf16.msrb.mxu3 %v2794_v38  ;;  %1329 = vmatmul.bf16.vlgmr.msrb.gmra.mxu0 %v101_v47  ;;  %v2899_v38 = vld [vmem:[#allocation6 + $0x10c] sm:$0xf]  ;;  %v2621_v42 = vor.u32 %v2903_v37, %v2620_v36  ;;  %v2890_v47 = vld [vmem:[#allocation6 + $0xc4] sm:$0xf]  ;;  %v2492_v37 = vld [vmem:[#allocation6 + $0x8] sm:$0xf] }
  0x8f   :  { %1343 = vmatmul.bf16.vlgmr.msrb.gmra.mxu1 %v102_v48  ;;  %1806 = vmatpush.bf16.msra.mxu0 %v2709_v56  ;;  %v2625_v46 = vor.u32 %v2899_v38, %v2622_v43  ;;  %v2582_v48 = vld [vmem:[#allocation6 + $0xe0] sm:$0xf0]  ;;  %v2871_v38 = vld [vmem:[#allocation6 + $0x24] sm:$0xf0]  ;;  %v2494_v43 = vld [vmem:[#allocation6 + $0x28] sm:$0xf0] }
  0x90   :  { %1357 = vmatmul.bf16.vlgmr.msrb.gmra.mxu2 %v103_v49  ;;  %1820 = vmatpush.bf16.msra.mxu1 %v2713_v62  ;;  %v2588_v49 = vld [vmem:[#allocation6 + $0xc8] sm:$0xf]  ;;  %v2585_v58 = vor.u32 %v2890_v47, %v2582_v48  ;;  %v2593_v62 = vor.u32 %v2891_v53, %v2590_v54  ;;  %v2486_v36 = vld [vmem:[#allocation6 + $0x20] sm:$0xf0]  ;;  %v2928_v47 = vld [vmem:[#allocation6 + $0x1ec] sm:$0xf0] }
  0x91   :  { %1371 = vmatmul.bf16.vlgmr.msrb.gmra.mxu3 %v104_v50  ;;  %1834 = vmatpush.bf16.msra.mxu2 %v2717_v63  ;;  %v2895_v50 = vld [vmem:[#allocation6 + $0xe4] sm:$0xf0]  ;;  %v2924_v48 = vld [vmem:[#allocation6 + $0x1d4] sm:$0xf]  ;;  %v2725_v53 = vor.u32 %v2928_v47, %v2724_v44  ;;  %v2638_v44 = vld [vmem:[#allocation6 + $0x138] sm:$0xf0] }
  0x92   :  { %1848 = vmatpush.bf16.msra.mxu3 %v2721_v2  ;;  %v2589_v59 = vor.u32 %v2895_v50, %v2588_v49  ;;  %v2886_v2 = vld [vmem:[#allocation6 + $0x9c] sm:$0xf0]  ;;  %v2726_v54 = vld [vmem:[#allocation6 + $0x1f0] sm:$0xf0] }
  0x93   :  { %1807 = vmatpush.bf16.msra.mxu0 %v2677_v7 }
  0x94   :  { %1821 = vmatpush.bf16.msra.mxu1 %v2681_v11  ;;  %v2883_v11 = vld [vmem:[#allocation6 + $0x8c] sm:$0xf] }
  0x95   :  { %1835 = vmatpush.bf16.msra.mxu2 %v2685_v12  ;;  %v2558_v12 = vld [vmem:[#allocation6 + $0xa8] sm:$0xf0] }
  0x96   :  { %1849 = vmatpush.bf16.msra.mxu3 %v2689_v16  ;;  %v2561_v13 = vor.u32 %v2883_v11, %v2558_v12  ;;  %v2878_v16 = vld [vmem:[#allocation6 + $0x5c] sm:$0xf0]  ;;  %v2917_v11 = vld [vmem:[#allocation6 + $0x19c] sm:$0xf] }
  0x97   :  { %1808 = vmatpush.bf16.msra.mxu0 %v2645_v21  ;;  %v2517_v19 = vor.u32 %v2878_v16, %v2516_v15  ;;  %v2518_v21 = vld [vmem:[#allocation6 + $0x60] sm:$0xf0]  ;;  %v2660_v16 = vld [vmem:[#allocation6 + $0x150] sm:$0xf] }
  0x98   :  { %1822 = vmatpush.bf16.msra.mxu1 %v2649_v26  ;;  %v2521_v26 = vor.u32 %v2874_v17, %v2518_v21  ;;  %v2912_v17 = vld [vmem:[#allocation6 + $0x16c] sm:$0xf0] }
  0x99   :  { %1836 = vmatpush.bf16.msra.mxu2 %v2653_v27  ;;  %v2525_v27 = vor.u32 %v2879_v23, %v2524_v22  ;;  %v2661_v21 = vor.u32 %v2912_v17, %v2660_v16  ;;  %v2668_v22 = vld [vmem:[#allocation6 + $0x158] sm:$0xf]  ;;  %v2574_v16 = vld [vmem:[#allocation6 + $0xb8] sm:$0xf0]  ;;  %v2532_v17 = vld [vmem:[#allocation6 + $0x50] sm:$0xf] }
  0x9a   :  { %1850 = vmatpush.bf16.msra.mxu3 %v2657_v31  ;;  %v2913_v23 = vld [vmem:[#allocation6 + $0x174] sm:$0xf0] }
  0x9b   :  { %1809 = vmatpush.bf16.msra.mxu0 %v2613_v35  ;;  %v2485_v35 = vor.u32 %v2870_v33, %v2484_v32 }
  0x9c   :  { %1823 = vmatpush.bf16.msra.mxu1 %v2617_v41  ;;  %v2493_v41 = vor.u32 %v2871_v38, %v2492_v37 }
  0x9d   :  { %1837 = vmatpush.bf16.msra.mxu2 %v2621_v42  ;;  %v2867_v42 = vld [vmem:[#allocation6 + $0xc] sm:$0xf] }
  0x9e   :  { %1851 = vmatpush.bf16.msra.mxu3 %v2625_v46  ;;  %v2497_v46 = vor.u32 %v2867_v42, %v2494_v43 }
  0x9f   :  { %1810 = vmatpush.bf16.msra.mxu0 %v2581_v57  ;;  %v2729_v57 = vor.u32 %v2924_v48, %v2726_v54  ;;  %v2896_v54 = vld [vmem:[#allocation6 + $0xec] sm:$0xf0] }
  0xa0   :  { %1824 = vmatpush.bf16.msra.mxu1 %v2585_v58 }
  0xa1   :  { %1838 = vmatpush.bf16.msra.mxu2 %v2589_v59  ;;  %v2925_v59 = vld [vmem:[#allocation6 + $0x1dc] sm:$0xf] }
  0xa2   :  { %1852 = vmatpush.bf16.msra.mxu3 %v2593_v62  ;;  %v2734_v62 = vld [vmem:[#allocation6 + $0x1f8] sm:$0xf0] }
  0xa5   :  { %1839 = vmatpush.bf16.msra.mxu2 %v2557_v10  ;;  %v2921_v10 = vld [vmem:[#allocation6 + $0x1b4] sm:$0xf0] }
  0xa6   :  { %1853 = vmatpush.bf16.msra.mxu3 %v2561_v13 }
  0xa9   :  { %1840 = vmatpush.bf16.msra.mxu2 %v2525_v27  ;;  %v2669_v27 = vor.u32 %v2913_v23, %v2668_v22  ;;  %v2876_v22 = vld [vmem:[#allocation6 + $0x54] sm:$0xf] }
  0xaa   :  { %v2534_v23 = vld [vmem:[#allocation6 + $0x70] sm:$0xf0] }
  0xab   :  { %v3193_v51 = vpop.f32.mrf.mxu0 }
  0xac   :  { %v3195_v52 = vpop.f32.mrf.mxu1 }
  0xad   :  { %v793_v55 = vadd.f32 %v3195_v52, %v3193_v51  ;;  %v2549_v51 = vor.u32 %v2886_v2, %v2548_v1  ;;  %v2550_v52 = vld [vmem:[#allocation6 + $0xa0] sm:$0xf0]  ;;  %1841 = vmatpush.bf16.msra.mxu2 %v2493_v41  ;;  %v2737_v1 = vor.u32 %v2925_v59, %v2734_v62  ;;  %v2920_v2 = vld [vmem:[#allocation6 + $0x1ac] sm:$0xf0]  ;;  %v2897_v59 = vld [vmem:[#allocation6 + $0xf4] sm:$0xf0] }
  0xae   :  { %v2553_v9 = vor.u32 %v2882_v3, %v2550_v52  ;;  %v2916_v3 = vld [vmem:[#allocation6 + $0x194] sm:$0xf] }
  0xaf   :  { %1811 = vmatpush.bf16.msra.mxu0 %v2549_v51  ;;  %v2694_v51 = vld [vmem:[#allocation6 + $0x1b0] sm:$0xf0] }
  0xb0   :  { %1825 = vmatpush.bf16.msra.mxu1 %v2553_v9  ;;  %v2697_v5 = vor.u32 %v2916_v3, %v2694_v51  ;;  %v2700_v9 = vld [vmem:[#allocation6 + $0x198] sm:$0xf]  ;;  %v2888_v3 = vld [vmem:[#allocation6 + $0xac] sm:$0xf0]  ;;  %v2884_v51 = vld [vmem:[#allocation6 + $0x94] sm:$0xf] }
  0xb1   :  { %v2701_v13 = vor.u32 %v2921_v10, %v2700_v9  ;;  %v2572_v10 = vld [vmem:[#allocation6 + $0x98] sm:$0xf] }
  0xb3   :  { %v3197_v60 = vpop.f32.mrf.mxu2  ;;  %v3201_v6 = vpop.f32.mrf.mxu0  ;;  %1812 = vmatpush.bf16.msra.mxu0 %v2517_v19  ;;  %v2908_v19 = vld [vmem:[#allocation6 + $0x154] sm:$0xf] }
  0xb4   :  { %v3199_v61 = vpop.f32.mrf.mxu3  ;;  %v3203_v20 = vpop.f32.mrf.mxu1  ;;  %v807_v0 = vadd.f32 %v3197_v60, %v793_v55  ;;  %1826 = vmatpush.bf16.msra.mxu1 %v2521_v26  ;;  %v2732_v55 = vld [vmem:[#allocation6 + $0x1d8] sm:$0xf] }
  0xb5   :  { %v795_v25 = vadd.f32 %v3203_v20, %v3201_v6  ;;  %v2489_v20 = vor.u32 %v2866_v34, %v2486_v36  ;;  %v2628_v34 = vld [vmem:[#allocation6 + $0x110] sm:$0xf]  ;;  %v2900_v36 = vld [vmem:[#allocation6 + $0x114] sm:$0xf] }
  0xb6   :  { %v821_v60 = vadd.f32 %v3199_v61, %v807_v0  ;;  %v2875_v61 = vld [vmem:[#allocation6 + $0x4c] sm:$0xf] }
  0xb7   :  { %v2529_v30 = vor.u32 %v2875_v61, %v2526_v28  ;;  %1813 = vmatpush.bf16.msra.mxu0 %v2485_v35  ;;  %v2670_v61 = vld [vmem:[#allocation6 + $0x178] sm:$0xf0]  ;;  %v2904_v35 = vld [vmem:[#allocation6 + $0x12c] sm:$0xf0] }
  0xb8   :  { %1827 = vmatpush.bf16.msra.mxu1 %v2489_v20  ;;  %v2629_v38 = vor.u32 %v2904_v35, %v2628_v34  ;;  %v2905_v20 = vld [vmem:[#allocation6 + $0x134] sm:$0xf0]  ;;  %v2872_v35 = vld [vmem:[#allocation6 + $0x2c] sm:$0xf0] }
  0xb9   :  { %1854 = vmatpush.bf16.msra.mxu3 %v2529_v30 }
  0xbb   :  { %v3205_v39 = vpop.f32.mrf.mxu2  ;;  %1862 = vmatpush.bf16.msrb.mxu0 %v2725_v53  ;;  %v2596_v53 = vld [vmem:[#allocation6 + $0xd0] sm:$0xf] }
  0xbc   :  { %v3207_v40 = vpop.f32.mrf.mxu3  ;;  %v809_v6 = vadd.f32 %v3205_v39, %v795_v25  ;;  %1876 = vmatpush.bf16.msrb.mxu1 %v2729_v57  ;;  %v2598_v57 = vld [vmem:[#allocation6 + $0xf0] sm:$0xf0] }
  0xbd   :  { %1855 = vmatpush.bf16.msra.mxu3 %v2497_v46  ;;  %v3232_v46 = vmul.f32 0.13435028, %v3160_v14 }
  0xbe   :  { %v823_v0 = vadd.f32 %v3207_v40, %v809_v6  ;;  %v2702_v40 = vld [vmem:[#allocation6 + $0x1b8] sm:$0xf0]  ;;  %v2636_v6 = vld [vmem:[#allocation6 + $0x118] sm:$0xf] }
  0xbf   :  { %v2705_v15 = vor.u32 %v2917_v11, %v2702_v40  ;;  %v2637_v43 = vor.u32 %v2905_v20, %v2636_v6  ;;  %v2889_v11 = vld [vmem:[#allocation6 + $0xb4] sm:$0xf0] }
  0xc0   :  { %1877 = vmatpush.bf16.msrb.mxu1 %v2697_v5  ;;  %v2508_v6 = vld [vmem:[#allocation6 + $0x18] sm:$0xf] }
  0xc1   :  { %1904 = vmatpush.bf16.msrb.mxu3 %v2737_v1  ;;  %v2606_v1 = vld [vmem:[#allocation6 + $0xf8] sm:$0xf0]  ;;  %v2873_v20 = vld [vmem:[#allocation6 + $0x34] sm:$0xf0] }
  0xc5   :  { %1905 = vmatpush.bf16.msrb.mxu3 %v2705_v15  ;;  %v2573_v15 = vor.u32 %v2889_v11, %v2572_v10 }
  0xcb   :  { %v834_v56 = vpop.f32.mrf.mxu0 }
  0xcc   :  { %v848_v63 = vpop.f32.mrf.mxu1  ;;  %v835_v29 = vadd.f32 %v834_v56, %v821_v60  ;;  %v2929_v56 = vld [vmem:[#allocation6 + $0x1f4] sm:$0xf0] }
  0xcd   :  { %v2733_v58 = vor.u32 %v2929_v56, %v2732_v55  ;;  %v2892_v55 = vld [vmem:[#allocation6 + $0xd4] sm:$0xf] }
  0xce   :  { %v849_v45 = vadd.f32 %v848_v63, %v835_v29  ;;  %v2692_v63 = vld [vmem:[#allocation6 + $0x190] sm:$0xf] }
  0xcf   :  { %1890 = vmatpush.bf16.msrb.mxu2 %v2733_v58  ;;  %v2693_v4 = vor.u32 %v2920_v2, %v2692_v63  ;;  %v2604_v58 = vld [vmem:[#allocation6 + $0xd8] sm:$0xf]  ;;  %v2601_v63 = vor.u32 %v2892_v55, %v2598_v57  ;;  %v2564_v2 = vld [vmem:[#allocation6 + $0x90] sm:$0xf] }
  0xd0   :  { %v2605_v14 = vor.u32 %v2897_v59, %v2604_v58  ;;  %v2565_v9 = vor.u32 %v2888_v3, %v2564_v2  ;;  %v2941_v2 = vld [vmem:[%s3310_s6] ss:$0 sm:$0xff] }
  0xd1   :  { %1863 = vmatpush.bf16.msrb.mxu0 %v2693_v4 }
  0xd3   :  { %v3212_v7 = vpop.f32.mrf.mxu2  ;;  %v3217_v18 = vpop.f32.mrf.mxu0  ;;  %1891 = vmatpush.bf16.msrb.mxu2 %v2701_v13 }
  0xd4   :  { %v3214_v8 = vpop.f32.mrf.mxu3  ;;  %v3221_v31 = vpop.f32.mrf.mxu1  ;;  %v863_v52 = vadd.f32 %v3212_v7, %v849_v45  ;;  %v837_v12 = vadd.f32 %v3217_v18, %v823_v0  ;;  %v2662_v7 = vld [vmem:[#allocation6 + $0x170] sm:$0xf0]  ;;  %v2909_v18 = vld [vmem:[#allocation6 + $0x15c] sm:$0xf] }
  0xd5   :  { %v2665_v26 = vor.u32 %v2908_v19, %v2662_v7  ;;  %v2673_v32 = vor.u32 %v2909_v18, %v2670_v61  ;;  %1864 = vmatpush.bf16.msrb.mxu0 %v2661_v21  ;;  %v2893_v0 = vld [vmem:[#allocation6 + $0xdc] sm:$0xf]  ;;  %v2880_v19 = vld [vmem:[#allocation6 + $0x6c] sm:$0xf0] }
  0xd6   :  { %v877_v25 = vadd.f32 %v3214_v8, %v863_v52  ;;  %v851_v28 = vadd.f32 %v3221_v31, %v837_v12  ;;  %v2630_v8 = vld [vmem:[#allocation6 + $0x130] sm:$0xf0]  ;;  %v2901_v31 = vld [vmem:[#allocation6 + $0x11c] sm:$0xf] }
  0xd7   :  { %1878 = vmatpush.bf16.msrb.mxu1 %v2665_v26  ;;  %1892 = vmatpush.bf16.msrb.mxu2 %v2669_v27  ;;  %v2633_v42 = vor.u32 %v2900_v36, %v2630_v8  ;;  %v2641_v45 = vor.u32 %v2901_v31, %v2638_v44  ;;  %v2566_v52 = vld [vmem:[#allocation6 + $0xb0] sm:$0xf0]  ;;  %v2885_v12 = vld [vmem:[#allocation6 + $0x9c] sm:$0xf]  ;;  %v2881_v27 = vld [vmem:[#allocation6 + $0x74] sm:$0xf0] }
  0xd8   :  { %1906 = vmatpush.bf16.msrb.mxu3 %v2673_v32  ;;  %v2569_v40 = vor.u32 %v2884_v51, %v2566_v52  ;;  %v2577_v7 = vor.u32 %v2885_v12, %v2574_v16  ;;  %v2877_v18 = vld [vmem:[#allocation6 + $0x5c] sm:$0xf]  ;;  %v2500_v32 = vld [vmem:[#allocation6 + $0x10] sm:$0xf]  ;;  %v2868_v36 = vld [vmem:[#allocation6 + $0x14] sm:$0xf] }
  0xd9   :  { %1865 = vmatpush.bf16.msrb.mxu0 %v2629_v38  ;;  %v2542_v61 = vld [vmem:[#allocation6 + $0x78] sm:$0xf0]  ;;  %v1381_v38 = vpop.permute.xlu0 %1380  ;;  %v1919_v44 = vmul.f32 0.13435028, %v3166_v24 }
  0xda   :  { %v2545_v8 = vor.u32 %v2877_v18, %v2542_v61  ;;  %v2510_v31 = vld [vmem:[#allocation6 + $0x38] sm:$0xf0] }
  0xdb   :  { %v864_v49 = vpop.f32.mrf.mxu2  ;;  %1879 = vmatpush.bf16.msrb.mxu1 %v2633_v42  ;;  %1893 = vmatpush.bf16.msrb.mxu2 %v2637_v43  ;;  %v2869_v43 = vld [vmem:[#allocation6 + $0x1c] sm:$0xf]  ;;  %v1921_v24 = vadd.f32 0.0070710676, %v1919_v44 }
  0xdc   :  { %v3224_v50 = vpop.f32.mrf.mxu3  ;;  %v865_v37 = vadd.f32 %v864_v49, %v851_v28  ;;  %1907 = vmatpush.bf16.msrb.mxu3 %v2641_v45 }
  0xde   :  { %v879_v48 = vadd.f32 %v3224_v50, %v865_v37  ;;  %v2609_v50 = vor.u32 %v2893_v0, %v2606_v1  ;;  %v2502_v37 = vld [vmem:[#allocation6 + $0x30] sm:$0xf0] }
  0xdf   :  { %1880 = vmatpush.bf16.msrb.mxu1 %v2601_v63  ;;  %1894 = vmatpush.bf16.msrb.mxu2 %v2605_v14 }
  0xe0   :  { %1908 = vmatpush.bf16.msrb.mxu3 %v2609_v50 }
  0xe1   :  { %v1386_v14 = vpop.permute.xlu0 %1385 }
  0xe3   :  { %1881 = vmatpush.bf16.msrb.mxu1 %v2569_v40  ;;  %1895 = vmatpush.bf16.msrb.mxu2 %v2573_v15 }
  0xe4   :  { %1909 = vmatpush.bf16.msrb.mxu3 %v2577_v7 }
  0xe8   :  { %1910 = vmatpush.bf16.msrb.mxu3 %v2545_v8 }
  0xeb   :  { %v1274_v39 = vpop.f32.mrf.mxu0 }
  0xec   :  { %v1288_v60 = vpop.f32.mrf.mxu1  ;;  %v1275_v33 = vadd.f32 %v1274_v39, %v877_v25  ;;  %v2597_v39 = vor.u32 %v2896_v54, %v2596_v53  ;;  %v2540_v25 = vld [vmem:[#allocation6 + $0x58] sm:$0xf]  ;;  %v2940_v53 = vld [vmem:[%s3309_s5] ss:$0 sm:$0xff] }
  0xed   :  { %v2541_v34 = vor.u32 %v2881_v27, %v2540_v25  ;;  %v1391_v58 = vmul.f32 %v2940_v53, %v1381_v38  ;;  %v1392_v51 = vmul.f32 %v2940_v53, %v1386_v14 }
  0xee   :  { %v1289_v47 = vadd.f32 %v1288_v60, %v1275_v33  ;;  %1866 = vmatpush.bf16.msrb.mxu0 %v2597_v39  ;;  %v2537_v33 = vor.u32 %v2876_v22, %v2534_v23  ;;  %v2513_v39 = vor.u32 %v2869_v43, %v2510_v31 }
  0xef   :  { %1896 = vmatpush.bf16.msrb.mxu2 %v2541_v34 }
  0xf0   :  { %1882 = vmatpush.bf16.msrb.mxu1 %v2537_v33  ;;  %1911 = vmatpush.bf16.msrb.mxu3 %v2513_v39 }
  0xf2   :  { %1867 = vmatpush.bf16.msrb.mxu0 %v2565_v9 }
  0xf3   :  { %v1302_v29 = vpop.f32.mrf.mxu2  ;;  %v1276_v41 = vpop.f32.mrf.mxu0 }
  0xf4   :  { %v1316_v30 = vpop.f32.mrf.mxu3  ;;  %v1290_v49 = vpop.f32.mrf.mxu1  ;;  %v1303_v56 = vadd.f32 %v1302_v29, %v1289_v47  ;;  %v1277_v62 = vadd.f32 %v1276_v41, %v879_v48  ;;  %v1920_v41 = vadd.f32 0.0070710676, %v3232_v46  ;;  %v2505_v46 = vor.u32 %v2868_v36, %v2502_v37 }
  0xf6   :  { %v1317_v60 = vadd.f32 %v1316_v30, %v1303_v56  ;;  %v1291_v21 = vadd.f32 %v1290_v49, %v1277_v62  ;;  %v2533_v30 = vor.u32 %v2880_v19, %v2532_v17  ;;  %v2501_v49 = vor.u32 %v2872_v35, %v2500_v32  ;;  %1924 = vperm.xlu1 %2939, %v1920_v41  }
  0xf7   :  { %v2509_v56 = vor.u32 %v2873_v20, %v2508_v6  ;;  %1883 = vmatpush.bf16.msrb.mxu1 %v2505_v46 }
  0xf8   :  { %1868 = vmatpush.bf16.msrb.mxu0 %v2533_v30 }
  0xf9   :  { %1897 = vmatpush.bf16.msrb.mxu2 %v2509_v56 }
  0xfb   :  { %v1304_v4 = vpop.f32.mrf.mxu2 }
  0xfc   :  { %v1318_v5 = vpop.f32.mrf.mxu3  ;;  %v1305_v28 = vadd.f32 %v1304_v4, %v1291_v21  ;;  %1869 = vmatpush.bf16.msrb.mxu0 %v2501_v49 }
  0xfe   :  { %v1319_v45 = vadd.f32 %v1318_v5, %v1305_v28  ;;  %1929 = vperm.xlu1 %2939, %v1921_v24  }
 0x10b   :  { %v1330_v13 = vpop.f32.mrf.mxu0 }
 0x10c   :  { %v1331_v26 = vadd.f32 %v1330_v13, %v1317_v60  ;;  %v1344_v29 = vpop.f32.mrf.mxu1  ;;  %v3246_v60 = vld [vmem:[%s3312_s8] sm:$0xff] }
 0x10d   :  { %v1470_v40 = vperm.slane %v3246_v60, 0  ;;  %v1471_v15 = vperm.slane %v3246_v60, 1  ;;  %v1472_v23 = vperm.slane %v3246_v60, 2  ;;  %v1473_v25 = vperm.slane %v3246_v60, 3 }
 0x10e   :  { %v1345_v42 = vadd.f32 %v1344_v29, %v1331_v26  ;;  %v1474_v38 = vperm.slane %v3246_v60, 4  ;;  %v1475_v8 = vperm.slane %v3246_v60, 5 }
 0x113   :  { %v1358_v47 = vpop.f32.mrf.mxu2  ;;  %v1332_v55 = vpop.f32.mrf.mxu0 }
 0x114   :  { %v1372_v48 = vpop.f32.mrf.mxu3  ;;  %v1359_v54 = vadd.f32 %v1358_v47, %v1345_v42  ;;  %v1333_v57 = vadd.f32 %v1332_v55, %v1319_v45  ;;  %v1346_v62 = vpop.f32.mrf.mxu1  ;;  %v1477_v55 = vperm.slane %v3246_v60, 7 }
 0x116   :  { %v1373_v59 = vadd.f32 %v1372_v48, %v1359_v54  ;;  %v1347_v63 = vadd.f32 %v1346_v62, %v1333_v57  ;;  %v1476_v54 = vperm.slane %v3246_v60, 6 }
 0x118   :  { %v1393_v1 = vadd.f32 %v1391_v58, %v1373_v59 }
 0x11a   :  { %v1399_v4 = vadd.f32 %v2941_v2, %v1393_v1 }
 0x11b   :  { %v1360_v0 = vpop.f32.mrf.mxu2 }
 0x11c   :  { %v1361_v50 = vadd.f32 %v1360_v0, %v1347_v63  ;;  %v1374_v3 = vpop.f32.mrf.mxu3  ;;  %v1401_v10 = vmax.f32 %v1399_v4, 0.0 }
 0x11e   :  { %v1375_v52 = vadd.f32 %v1374_v3, %v1361_v50 }
 0x120   :  { %v1394_v5 = vadd.f32 %v1392_v51, %v1375_v52 }
 0x122   :  { %v1400_v9 = vadd.f32 %v2941_v2, %v1394_v5 }
 0x124   :  { %v1402_v11 = vmax.f32 %v1400_v9, 0.0 }
 0x126   :  { %v1403_v12 = vpack.c.bf16 %v1402_v11, %v1401_v10 }
 0x128   :  { %1814 = vmatmul.bf16.vlgmr.msra.gmra.mxu0 %v1403_v12  ;;  %1828 = vmatmul.bf16.vlgmr.msra.gmra.mxu1 %v1403_v12 }
 0x129   :  { %1842 = vmatmul.bf16.vlgmr.msra.gmra.mxu2 %v1403_v12  ;;  %1856 = vmatmul.bf16.vlgmr.msra.gmra.mxu3 %v1403_v12 }
 0x138   :  { %1870 = vmatmul.bf16.vlgmr.msrb.gmra.mxu0 %v1403_v12  ;;  %1884 = vmatmul.bf16.vlgmr.msrb.gmra.mxu1 %v1403_v12 }
 0x139   :  { %1898 = vmatmul.bf16.vlgmr.msrb.gmra.mxu2 %v1403_v12  ;;  %1912 = vmatmul.bf16.vlgmr.msrb.gmra.mxu3 %v1403_v12 }
 0x168   :  { %v1925_v13 = vpop.permute.xlu1 %1924 }
 0x170   :  { %v1930_v26 = vpop.permute.xlu1 %1929 }
 0x1a5   :  { %v1815_v16 = vpop.f32.mrf.mxu0  ;;  %v1829_v17 = vpop.f32.mrf.mxu1 }
 0x1a6   :  { %v1816_v19 = vadd.f32 %v1815_v16, %v1470_v40  ;;  %v1830_v21 = vadd.f32 %v1829_v17, %v1471_v15 }
 0x1a8   :  { %v1932_v7 = vmul.f32 %v1925_v13, %v1816_v19  ;;  %v1933_v22 = vmul.f32 %v1925_v13, %v1830_v21 }
 0x1aa   :  { %1948 = vst [vmem:[%s3313_s9] sm:$0xff] %v1932_v7 }
 0x1ab   :  { %1949 = vst [vmem:[%s3313_s9 + $0x8] sm:$0xff] %v1933_v22 }
 0x1ac   :  { %v1843_v27 = vpop.f32.mrf.mxu2  ;;  %v1857_v18 = vpop.f32.mrf.mxu3 }
 0x1ad   :  { %v1844_v61 = vadd.f32 %v1843_v27, %v1472_v23  ;;  %v1858_v28 = vadd.f32 %v1857_v18, %v1473_v25  ;;  %v1817_v29 = vpop.f32.mrf.mxu0  ;;  %v1831_v30 = vpop.f32.mrf.mxu1 }
 0x1ae   :  { %v1818_v32 = vadd.f32 %v1817_v29, %v1470_v40  ;;  %v1832_v33 = vadd.f32 %v1831_v30, %v1471_v15 }
 0x1af   :  { %v1934_v34 = vmul.f32 %v1925_v13, %v1844_v61  ;;  %v1935_v35 = vmul.f32 %v1925_v13, %v1858_v28 }
 0x1b0   :  { %v1940_v36 = vmul.f32 %v1930_v26, %v1818_v32  ;;  %v1941_v37 = vmul.f32 %v1930_v26, %v1832_v33 }
 0x1b1   :  { %1950 = vst [vmem:[%s3313_s9 + $0x10] sm:$0xff] %v1934_v34 }
 0x1b2   :  { %1951 = vst [vmem:[%s3313_s9 + $0x18] sm:$0xff] %v1935_v35 }
 0x1b3   :  { %1956 = vst [vmem:[%s3313_s9 + $0x40] sm:$0xff] %v1940_v36 }
 0x1b4   :  { %1957 = vst [vmem:[%s3313_s9 + $0x48] sm:$0xff] %v1941_v37  ;;  %v1845_v6 = vpop.f32.mrf.mxu2  ;;  %v1859_v20 = vpop.f32.mrf.mxu3 }
 0x1b5   :  { %v1846_v41 = vadd.f32 %v1845_v6, %v1472_v23  ;;  %v1860_v42 = vadd.f32 %v1859_v20, %v1473_v25  ;;  %v1871_v43 = vpop.f32.mrf.mxu0  ;;  %v1885_v31 = vpop.f32.mrf.mxu1 }
 0x1b6   :  { %v1872_v44 = vadd.f32 %v1871_v43, %v1474_v38  ;;  %v1886_v45 = vadd.f32 %v1885_v31, %v1475_v8 }
 0x1b7   :  { %v1942_v47 = vmul.f32 %v1930_v26, %v1846_v41  ;;  %v1943_v48 = vmul.f32 %v1930_v26, %v1860_v42 }
 0x1b8   :  { %v1936_v49 = vmul.f32 %v1925_v13, %v1872_v44  ;;  %v1937_v53 = vmul.f32 %v1925_v13, %v1886_v45 }
 0x1b9   :  { %1958 = vst [vmem:[%s3313_s9 + $0x50] sm:$0xff] %v1942_v47 }
 0x1ba   :  { %1959 = vst [vmem:[%s3313_s9 + $0x58] sm:$0xff] %v1943_v48 }
 0x1bb   :  { %1952 = vst [vmem:[%s3313_s9 + $0x20] sm:$0xff] %v1936_v49 }
 0x1bc   :  { %1953 = vst [vmem:[%s3313_s9 + $0x28] sm:$0xff] %v1937_v53  ;;  %v1899_v46 = vpop.f32.mrf.mxu2  ;;  %v1913_v56 = vpop.f32.mrf.mxu3 }
 0x1bd   :  { %v1900_v39 = vadd.f32 %v1899_v46, %v1476_v54  ;;  %v1914_v57 = vadd.f32 %v1913_v56, %v1477_v55  ;;  %v1873_v24 = vpop.f32.mrf.mxu0  ;;  %v1887_v58 = vpop.f32.mrf.mxu1 }
 0x1be   :  { %v1874_v59 = vadd.f32 %v1873_v24, %v1474_v38  ;;  %v1888_v62 = vadd.f32 %v1887_v58, %v1475_v8 }
 0x1bf   :  { %v1938_v63 = vmul.f32 %v1925_v13, %v1900_v39  ;;  %v1939_v14 = vmul.f32 %v1925_v13, %v1914_v57 }
 0x1c0   :  { %v1944_v0 = vmul.f32 %v1930_v26, %v1874_v59  ;;  %v1945_v1 = vmul.f32 %v1930_v26, %v1888_v62 }
 0x1c1   :  { %1954 = vst [vmem:[%s3313_s9 + $0x30] sm:$0xff] %v1938_v63 }
 0x1c2   :  { %1955 = vst [vmem:[%s3313_s9 + $0x38] sm:$0xff] %v1939_v14 }
 0x1c3   :  { %1960 = vst [vmem:[%s3313_s9 + $0x60] sm:$0xff] %v1944_v0 }
 0x1c4   :  { %1961 = vst [vmem:[%s3313_s9 + $0x68] sm:$0xff] %v1945_v1  ;;  %v1901_v2 = vpop.f32.mrf.mxu2  ;;  %v1915_v50 = vpop.f32.mrf.mxu3 }
 0x1c5   :  { %v1902_v3 = vadd.f32 %v1901_v2, %v1476_v54  ;;  %v1916_v51 = vadd.f32 %v1915_v50, %v1477_v55 }
 0x1c7   :  { %v1946_v52 = vmul.f32 %v1930_v26, %v1902_v3  ;;  %v1947_v4 = vmul.f32 %v1930_v26, %v1916_v51 }
 0x1c9   :  { %1962 = vst [vmem:[%s3313_s9 + $0x70] sm:$0xff] %v1946_v52 }
 0x1ca   :  { %1963 = vst [vmem:[%s3313_s9 + $0x78] sm:$0xff] %v1947_v4 }
 0x1cb   :  { %1968 = vsyncpa [#allocation3], 1 }
 0x1cc   :  { %1969 = vsyncpa [#allocation5], 1 }

</bundles_post_ra>
